<compile_context>
chip_gen: v5e
topology: v5e:2x2
jax: 0.10.0
libtpu: 0.0.40
codegen_flags: <defaults>
</compile_context>

<pallas_src>
import jax
import jax.numpy as jnp
from jax import lax
from jax.experimental import pallas as pl
from jax.experimental.pallas import tpu as pltpu

_EPS = 1e-12  # matches F.normalize default eps


def _round_up(a, b):
    return (a + b - 1) // b * b


def _cosine_distance_kernel(x_ref, w_ref, inv_x_ref, o_ref, acc_ref):
    """Grid = (N tiles, M tiles, K tiles over D).

    x_ref:     (TN, TK) raw (un-normalized) x, native dtype -> fed straight to the MXU
    w_ref:     (TM, TK) weight pre-scaled by 1/||w|| in the wrapper
    inv_x_ref: (TN, 1)  f32 per-row 1/max(||x||, eps), precomputed in the wrapper
    o_ref:     (TN, TM) f32 output tile (resident across k)
    acc_ref:   (TN, TM) f32 VMEM accumulator
    """
    k = pl.program_id(2)

    @pl.when(k == 0)
    def _():
        acc_ref[...] = jnp.zeros_like(acc_ref)

    # Raw similarity: contract the last dim of both operands (no transpose, MXU-native).
    acc_ref[...] += lax.dot_general(
        x_ref[...], w_ref[...],
        dimension_numbers=(((1,), (1,)), ((), ())),
        preferred_element_type=jnp.float32)

    @pl.when(k == pl.num_programs(2) - 1)
    def _():
        # Tiny epilogue on the (TN, TM) tile: post-scale by 1/||x||, then 1 - cos_sim.
        o_ref[...] = (1.0 - acc_ref[...] * inv_x_ref[...]).astype(o_ref.dtype)


def cosine_distance(x, weight, *, tn=None, tm=None, tk=None, use_bf16=False):
    """x: (N, D); weight: (M, D) (already-transposed reference vectors).
    Returns (N, M) float32 cosine distances 1 - cos(x_i, w_j)."""
    N, D = x.shape
    M, Dw = weight.shape
    assert D == Dw, "feature dims must match"

    # ---- trace-time preprocessing (weight is a fixed, pre-normalized module param) ----
    w32 = weight.astype(jnp.float32)
    inv_w = lax.rsqrt(jnp.maximum(jnp.sum(w32 * w32, axis=1, keepdims=True),
                                  _EPS * _EPS))                      # (M, 1)
    w_scaled = w32 * inv_w                                           # fold 1/||w|| into weight

    x32 = x.astype(jnp.float32)
    inv_x = lax.rsqrt(jnp.maximum(jnp.sum(x32 * x32, axis=1, keepdims=True),
                                  _EPS * _EPS))                      # (N, 1), hoisted out of kernel

    in_dtype = jnp.bfloat16 if use_bf16 else jnp.float32
    x_in = x.astype(in_dtype)
    w_in = w_scaled.astype(in_dtype)

    sublane = 16 if use_bf16 else 8

    # ---- tile sizes: lane-dense on M/K (multiples of 128), dtype-aligned sublanes on N ----
    TN = tn if tn is not None else min(512, _round_up(N, sublane))
    TM = tm if tm is not None else min(512, _round_up(M, 128))
    D_pad0 = _round_up(D, 128)
    if tk is not None:
        TK = tk
    else:
        n_k = pl.cdiv(D_pad0, 1024)                    # cap TK ~1 K, minimize padding
        TK = _round_up(pl.cdiv(D_pad0, n_k), 128)

    N_pad = _round_up(N, TN)
    M_pad = _round_up(M, TM)
    D_pad = _round_up(D, TK)

    x_p = jnp.pad(x_in, ((0, N_pad - N), (0, D_pad - D)))
    w_p = jnp.pad(w_in, ((0, M_pad - M), (0, D_pad - D)))
    inv_x_p = jnp.pad(inv_x, ((0, N_pad - N), (0, 0))).astype(jnp.float32)

    grid = (N_pad // TN, M_pad // TM, D_pad // TK)
    n_i, n_j, n_k = grid

    bytes_accessed = (x_p.size * x_p.dtype.itemsize * n_j      # x re-read per M tile
                      + w_p.size * w_p.dtype.itemsize * n_i    # w re-read per N tile
                      + inv_x_p.size * 4 * n_j
                      + N_pad * M_pad * 4)                     # output written once

    out = pl.pallas_call(
        _cosine_distance_kernel,
        out_shape=jax.ShapeDtypeStruct((N_pad, M_pad), jnp.float32),
        grid_spec=pltpu.PrefetchScalarGridSpec(
            num_scalar_prefetch=0,
            grid=grid,
            in_specs=[
                pl.BlockSpec((TN, TK), lambda i, j, k: (i, k)),   # x tile
                pl.BlockSpec((TM, TK), lambda i, j, k: (j, k)),   # pre-scaled weight tile
                pl.BlockSpec((TN, 1), lambda i, j, k: (i, 0)),    # 1/||x|| per row
            ],
            out_specs=pl.BlockSpec((TN, TM), lambda i, j, k: (i, j)),
            scratch_shapes=[pltpu.VMEM((TN, TM), jnp.float32)],   # f32 accumulator over k
        ),
        compiler_params=pltpu.CompilerParams(
            dimension_semantics=("parallel", "parallel", "arbitrary"),
            vmem_limit_bytes=32 * 1024 * 1024,
        ),
        cost_estimate=pl.CostEstimate(
            flops=2 * N_pad * M_pad * D_pad,
            transcendentals=0,
            bytes_accessed=bytes_accessed,
        ),
    )(x_p, w_p, inv_x_p)

    return out[:N, :M]


def cosine_distance_ref(x, weight):
    x = x.astype(jnp.float32)
    weight = weight.astype(jnp.float32)
    x_n = x / jnp.maximum(jnp.linalg.norm(x, axis=1, keepdims=True), _EPS)
    w_n = weight / jnp.maximum(jnp.linalg.norm(weight, axis=1, keepdims=True), _EPS)
    return 1.0 - x_n @ w_n.T


if __name__ == "__main__":
    key = jax.random.PRNGKey(0)
    k1, k2, k3, k4, k5, k6 = jax.random.split(key, 6)

    # Case 1: module-style shapes. vectors: (D, M); weight = vectors.T -> (M, D).
    N, D, M = 8, 32, 16
    x = jax.random.normal(k1, (N, D), dtype=jnp.float32)
    vectors = jax.random.normal(k2, (D, M), dtype=jnp.float32)
    weight = vectors.T  # (M, D)
    out = jax.block_until_ready(cosine_distance(x, weight))
    ref = cosine_distance_ref(x, weight)
    assert out.shape == (N, M)
    assert jnp.allclose(out, ref, atol=1e-5, rtol=1e-5), (
        float(jnp.max(jnp.abs(out - ref))))

    # Case 2: non-aligned shapes -> padding path.
    N2, D2, M2 = 260, 200, 170
    x2 = jax.random.normal(k3, (N2, D2), dtype=jnp.float32)
    w2 = jax.random.normal(k4, (M2, D2), dtype=jnp.float32)
    out2 = jax.block_until_ready(cosine_distance(x2, w2))
    ref2 = cosine_distance_ref(x2, w2)
    assert out2.shape == (N2, M2)
    assert jnp.allclose(out2, ref2, atol=1e-4, rtol=1e-4), (
        float(jnp.max(jnp.abs(out2 - ref2))))

    # Case 3: full 3-D grid — multiple N/M tiles plus the K reduction axis + accumulator.
    N3, D3, M3 = 96, 1300, 272
    x3 = jax.random.normal(k5, (N3, D3), dtype=jnp.float32)
    w3 = jax.random.normal(k6, (M3, D3), dtype=jnp.float32)
    out3 = jax.block_until_ready(cosine_distance(x3, w3, tn=48, tm=128))
    ref3 = cosine_distance_ref(x3, w3)
    assert out3.shape == (N3, M3)
    assert jnp.allclose(out3, ref3, atol=1e-4, rtol=1e-4), (
        float(jnp.max(jnp.abs(out3 - ref3))))

    # Case 4: bf16 MXU inputs (f32 accumulation), relaxed tolerance.
    out4 = jax.block_until_ready(cosine_distance(x2, w2, use_bf16=True))
    assert jnp.allclose(out4, ref2, atol=5e-2, rtol=5e-2), (
        float(jnp.max(jnp.abs(out4 - ref2))))

    print("KERNEL_OK")
</pallas_src>

<mosaic_0001>
module attributes {stable_mosaic.version = 11 : i64} {
  func.func @_cosine_distance_kernel(%arg0: i32, %arg1: i32, %arg2: i32, %arg3: memref<8x128xf32, #tpu.memory_space<vmem>>, %arg4: memref<128x128xf32, #tpu.memory_space<vmem>>, %arg5: memref<8x1xf32, #tpu.memory_space<vmem>>, %arg6: memref<8x128xf32, #tpu.memory_space<vmem>>, %arg7: memref<8x128xf32, #tpu.memory_space<vmem>>) attributes {dimension_semantics = [#tpu.dimension_semantics<parallel>, #tpu.dimension_semantics<parallel>, #tpu.dimension_semantics<arbitrary>], iteration_bounds = array<i64: 1, 1, 1>, scalar_prefetch = 0 : i64, scratch_operands = 1 : i64, tpu.core_type = #tpu.core_type<tc>, window_params = [{transform_indices = @transform_0, window_bounds = array<i64: 8, 128>}, {transform_indices = @transform_1, window_bounds = array<i64: 128, 128>}, {transform_indices = @transform_2, window_bounds = array<i64: 8, 1>}, {transform_indices = @transform_3, window_bounds = array<i64: 8, 128>}]} {
    %c0_i32 = arith.constant 0 : i32
    %0 = arith.cmpi eq, %arg2, %c0_i32 : i32
    %1 = arith.extui %0 : i1 to i32
    %c0_i32_0 = arith.constant 0 : i32
    %2 = arith.cmpi ne, %1, %c0_i32_0 : i32
    scf.if %2 {
      %cst_10 = arith.constant 0.000000e+00 : f32
      %12 = vector.broadcast %cst_10 : f32 to vector<8x128xf32>
      %c0_11 = arith.constant 0 : index
      %c0_12 = arith.constant 0 : index
      %13 = vector.load %arg7[%c0_11, %c0_12] : memref<8x128xf32, #tpu.memory_space<vmem>>, vector<8x128xf32>
      tpu.vector_store %arg7[%c0_11, %c0_12], %12 {strides = array<i32>} : memref<8x128xf32, #tpu.memory_space<vmem>>, vector<8x128xf32>,
    } else {
    }
    %c0 = arith.constant 0 : index
    %c0_1 = arith.constant 0 : index
    %3 = vector.load %arg7[%c0, %c0_1] : memref<8x128xf32, #tpu.memory_space<vmem>>, vector<8x128xf32>
    %c0_2 = arith.constant 0 : index
    %c0_3 = arith.constant 0 : index
    %4 = vector.load %arg3[%c0_2, %c0_3] : memref<8x128xf32, #tpu.memory_space<vmem>>, vector<8x128xf32>
    %c0_4 = arith.constant 0 : index
    %c0_5 = arith.constant 0 : index
    %5 = vector.load %arg4[%c0_4, %c0_5] : memref<128x128xf32, #tpu.memory_space<vmem>>, vector<128x128xf32>
    %cst = arith.constant dense<0.000000e+00> : vector<8x128xf32>
    %6 = tpu.matmul %4, %5, %cst {dimension_numbers = #tpu.dot_dimension_numbers<[1], [1], [0], [0], [0, 0, 1, 0], [], []>} : vector<8x128xf32>, vector<128x128xf32>, vector<8x128xf32> -> vector<8x128xf32>
    %7 = arith.addf %3, %6 : vector<8x128xf32>
    %c0_6 = arith.constant 0 : index
    %c0_7 = arith.constant 0 : index
    %8 = vector.load %arg7[%c0_6, %c0_7] : memref<8x128xf32, #tpu.memory_space<vmem>>, vector<8x128xf32>
    tpu.vector_store %arg7[%c0_6, %c0_7], %7 {strides = array<i32>} : memref<8x128xf32, #tpu.memory_space<vmem>>, vector<8x128xf32>,
    %c0_i32_8 = arith.constant 0 : i32
    %9 = arith.cmpi eq, %arg2, %c0_i32_8 : i32
    %10 = arith.extui %9 : i1 to i32
    %c0_i32_9 = arith.constant 0 : i32
    %11 = arith.cmpi ne, %10, %c0_i32_9 : i32
    scf.if %11 {
      %c0_10 = arith.constant 0 : index
      %c0_11 = arith.constant 0 : index
      %12 = vector.load %arg7[%c0_10, %c0_11] : memref<8x128xf32, #tpu.memory_space<vmem>>, vector<8x128xf32>
      %c0_12 = arith.constant 0 : index
      %c0_13 = arith.constant 0 : index
      %13 = vector.load %arg5[%c0_12, %c0_13] : memref<8x1xf32, #tpu.memory_space<vmem>>, vector<8x1xf32>
      %14 = vector.broadcast %13 : vector<8x1xf32> to vector<8x128xf32>
      %15 = arith.mulf %12, %14 : vector<8x128xf32>
      %cst_14 = arith.constant 1.000000e+00 : f32
      %16 = vector.broadcast %cst_14 : f32 to vector<8x128xf32>
      %17 = arith.subf %16, %15 : vector<8x128xf32>
      %c0_15 = arith.constant 0 : index
      %c0_16 = arith.constant 0 : index
      %18 = vector.load %arg6[%c0_15, %c0_16] : memref<8x128xf32, #tpu.memory_space<vmem>>, vector<8x128xf32>
      tpu.vector_store %arg6[%c0_15, %c0_16], %17 {strides = array<i32>} : memref<8x128xf32, #tpu.memory_space<vmem>>, vector<8x128xf32>,
    } else {
    }
    return
  }
  func.func @transform_0(%arg0: i32, %arg1: i32, %arg2: i32) -> (i32, i32) {
    %c0_i32 = arith.constant 0 : i32
    return %arg0, %arg2 : i32, i32
  }
  func.func @transform_1(%arg0: i32, %arg1: i32, %arg2: i32) -> (i32, i32) {
    %c0_i32 = arith.constant 0 : i32
    return %arg1, %arg2 : i32, i32
  }
  func.func @transform_2(%arg0: i32, %arg1: i32, %arg2: i32) -> (i32, i32) {
    %c0_i32 = arith.constant 0 : i32
    %c0_i32_0 = arith.constant 0 : i32
    return %arg0, %c0_i32 : i32, i32
  }
  func.func @transform_3(%arg0: i32, %arg1: i32, %arg2: i32) -> (i32, i32) {
    %c0_i32 = arith.constant 0 : i32
    return %arg0, %arg1 : i32, i32
  }
}

</mosaic_0001>

<bundles_post_ra>
// kernel: tpu_custom_call.1
= control target key start
LH: loop header
LB: loop body
LE: loop exit
PB: predicated region body
PF: predicated region fallthrough
CT: control target
= control target key end

     0   :  { %8 = vsyncpa [#allocation4], 0  ;;  %s201_s0 = inlined_call_operand.vmem [shape: f32[8,128], index: 0, kind: input, shape index: {}]   ;;  %s202_s1 = inlined_call_operand.hbm [shape: f32[128,128], index: 1, kind: input, shape index: {}]   ;;  %s203_s2 = inlined_call_operand.vmem [shape: f32[8,1], index: 2, kind: input, shape index: {}]   ;;  %s204_s3 = inlined_call_operand.hbm [shape: f32[8,128], index: 3, kind: output, shape index: {}]  }
   0x1   :  { %9 = vsyncpa [#allocation5], 0  ;;  %s16_s14 = sshll.u32 %s202_s1, 4  ;;  %s164_s15 = smov [#allocation3]   ;;  %s17_s14 = int_to_ptr.hbm [resolvable:$true] %s16_s14 }
   0x2   :  { %s18_s16 = sshll.u32 %s164_s15, 4  ;;  %s165_s17 = smov 128   ;;  %s19_s16 = int_to_ptr.vmem [resolvable:$true] %s18_s16 }
   0x3   :  { %s166_s18 = smov 8  }
   0x4   :  { %24 = dma.hbm_to_vmem [thread:$0]  %s17_s14, 2048, %s19_s16, [#allocation4], %s165_s17, %s165_s17, %s166_s18  }
   0x5   :  { %160 = dma.done.wait [#allocation4], 2048  }
   0x6   :  { %161 = vsyncadd [#allocation4], 4294965248  ;;  %v53_v0 = vld [vmem:[#allocation3 + $0x78] sm:$0xff]  ;;  %v52_v1 = vld [vmem:[#allocation3 + $0x70] sm:$0xff]  ;;  %v167_v10 = vmov 0   ;;  %s168_s21 = smov [#allocation6]  }
   0x7   :  { %54 = vmatpush.xpose.msra.mxu0 %v53_v0  ;;  %v51_v2 = vld [vmem:[#allocation3 + $0x68] sm:$0xff]  ;;  %v50_v3 = vld [vmem:[#allocation3 + $0x60] sm:$0xff]  ;;  %v49_v4 = vld [vmem:[#allocation3 + $0x58] sm:$0xff]  ;;  %111 = vset.pattern.permute.xlu0 %v167_v10  ;;  %s94_s22 = sshll.u32 %s168_s21, 4  ;;  %s96_s25 = sshll.u32 %s204_s3, 4  ;;  %s95_s22 = int_to_ptr.vmem [resolvable:$true] %s94_s22  ;;  %s97_s25 = int_to_ptr.hbm [resolvable:$true] %s96_s25 }
   0x8   :  { %v48_v5 = vld [vmem:[#allocation3 + $0x50] sm:$0xff]  ;;  %v47_v6 = vld [vmem:[#allocation3 + $0x48] sm:$0xff]  ;;  %v46_v7 = vld [vmem:[#allocation3 + $0x40] sm:$0xff] }
   0x9   :  { %v45_v8 = vld [vmem:[#allocation3 + $0x38] sm:$0xff]  ;;  %v80_v9 = vld [vmem:[%s203_s2] sm:$0xff]  ;;  %v44_v11 = vld [vmem:[#allocation3 + $0x30] sm:$0xff] }
   0xa   :  { %83 = vperm.xlu0 %111, %v80_v9   ;;  %v43_v12 = vld [vmem:[#allocation3 + $0x28] sm:$0xff]  ;;  %v42_v13 = vld [vmem:[#allocation3 + $0x20] sm:$0xff]  ;;  %v41_v14 = vld [vmem:[#allocation3 + $0x18] sm:$0xff] }
   0xb   :  { %55 = vmatpush.xpose.msra.mxu0 %v52_v1  ;;  %v40_v15 = vld [vmem:[#allocation3 + $0x10] sm:$0xff]  ;;  %v39_v16 = vld [vmem:[#allocation3 + $0x8] sm:$0xff]  ;;  %v38_v17 = vld [vmem:[#allocation3] sm:$0xff] }
   0xc   :  { %v37_v18 = vld [vmem:[%s201_s0] sm:$0xff] }
   0xf   :  { %56 = vmatpush.xpose.msra.mxu0 %v51_v2 }
  0x13   :  { %57 = vmatpush.xpose.msra.mxu0 %v50_v3 }
  0x17   :  { %58 = vmatpush.xpose.msra.mxu0 %v49_v4 }
  0x1b   :  { %59 = vmatpush.xpose.msra.mxu0 %v48_v5 }
  0x1f   :  { %60 = vmatpush.xpose.msra.mxu0 %v47_v6 }
  0x23   :  { %61 = vmatpush.xpose.msra.mxu0 %v46_v7 }
  0x27   :  { %62 = vmatpush.xpose.msra.mxu0 %v45_v8 }
  0x2b   :  { %63 = vmatpush.xpose.msra.mxu0 %v44_v11 }
  0x2f   :  { %64 = vmatpush.xpose.msra.mxu0 %v43_v12 }
  0x33   :  { %65 = vmatpush.xpose.msra.mxu0 %v42_v13 }
  0x37   :  { %66 = vmatpush.xpose.msra.mxu0 %v41_v14 }
  0x3b   :  { %67 = vmatpush.xpose.msra.mxu0 %v40_v15 }
  0x3f   :  { %68 = vmatpush.xpose.msra.mxu0 %v39_v16 }
  0x43   :  { %69 = vmatpush.xpose.msra.mxu0 %v38_v17 }
  0x46   :  { %70 = vmatmul.f32.vlgmr.msra.gmra.mxu0 %v37_v18 }
  0x7c   :  { %v84_v19 = vpop.permute.xlu0 %83 }
  0xc3   :  { %v71_v20 = vpop.f32.mrf.mxu0 }
  0xc4   :  { %v86_v21 = vmul.f32 %v84_v19, %v71_v20 }
  0xc6   :  { %v87_v22 = vsub.f32 1.0, %v86_v21 }
  0xc8   :  { %88 = vst [vmem:[#allocation6] sm:$0xff] %v87_v22 }
  0xc9   :  { %99 = dma.vmem_to_hbm [thread:$0]  %s95_s22, 128, %s97_s25, [#allocation5]  }
  0xca   :  { %162 = dma.done.wait [#allocation5], 128  }
  0xcb   :  { %163 = vsyncadd [#allocation5], 4294967168 }
  0xcc   :  { %104 = vsyncpa [#allocation4], 1 }
  0xcd   :  { %105 = vsyncpa [#allocation5], 1 }

</bundles_post_ra>
